<compile_context>
chip_gen: v7x
topology: tpu7x:2x2x1
jax: 0.10.0
libtpu: 0.0.40
codegen_flags: <defaults>
</compile_context>

<pallas_src>
import jax
import jax.numpy as jnp
from jax.experimental import pallas as pl
from jax.experimental.pallas import tpu as pltpu


def _adaptation_kernel(x_ref, w_ref, o_ref):
    # x_ref: (tb, n_dim); w_ref: (1, n_dim); o_ref: (tb, n_dim)
    w_relu = jnp.maximum(w_ref[...], jnp.zeros((), dtype=w_ref.dtype))
    o_ref[...] = (x_ref[...] * w_relu).astype(o_ref.dtype)


def adaptation_forward(x, w, *, tb=1024):
    """x: (..., n_dim), w: (n_dim,)  ->  x * relu(w)  (broadcast over rows)."""
    n_dim = w.shape[-1]
    assert x.shape[-1] == n_dim, "feature dim of x must match W"
    orig_shape = x.shape
    x2d = x.reshape(-1, n_dim)
    B = x2d.shape[0]
    w2 = w.reshape(1, n_dim)  # feature axis on lanes, broadcast over sublanes

    bytes_accessed = (x2d.size + w2.size + x2d.size) * x2d.dtype.itemsize
    cost = pl.CostEstimate(flops=2 * B * n_dim, transcendentals=0,
                           bytes_accessed=bytes_accessed)

    if B <= tb:
        # Single step: whole problem lives in VMEM, one fused relu*mul, one
        # lane-dense store.  No grid overhead.
        out = pl.pallas_call(
            _adaptation_kernel,
            out_shape=jax.ShapeDtypeStruct((B, n_dim), x2d.dtype),
            in_specs=[
                pl.BlockSpec((B, n_dim), lambda: (0, 0)),
                pl.BlockSpec((1, n_dim), lambda: (0, 0)),
            ],
            out_specs=pl.BlockSpec((B, n_dim), lambda: (0, 0)),
            cost_estimate=cost,
        )(x2d, w2)
        return out.reshape(orig_shape)

    # Large batch: keep the weight row resident, stream activation row tiles
    # on a parallel grid axis.  Big tiles (tb rows) + raised VMEM limit keep
    # this near the HBM roofline; partial last tile is handled by Pallas.
    grid = (pl.cdiv(B, tb),)
    out = pl.pallas_call(
        _adaptation_kernel,
        out_shape=jax.ShapeDtypeStruct((B, n_dim), x2d.dtype),
        grid_spec=pl.GridSpec(
            grid=grid,
            in_specs=[
                pl.BlockSpec((tb, n_dim), lambda i: (i, 0)),
                pl.BlockSpec((1, n_dim), lambda i: (0, 0)),   # W pinned
            ],
            out_specs=pl.BlockSpec((tb, n_dim), lambda i: (i, 0)),
        ),
        compiler_params=pltpu.CompilerParams(
            dimension_semantics=("parallel",),
            vmem_limit_bytes=64 << 20,
        ),
        cost_estimate=cost,
    )(x2d, w2)
    return out.reshape(orig_shape)


def adaptation_reference(x, w):
    return x * jnp.maximum(w, 0.0)


if __name__ == "__main__":
    key = jax.random.PRNGKey(0)
    k_x, k_w, k_x2 = jax.random.split(key, 3)

    # Small deterministic shapes consistent with the module: batch=8 rows of
    # n_dim=128 features; W is the (n_dim,) parameter (random here so relu
    # actually clips some entries; the module initializes it to ones).
    B, n_dim = 8, 128
    x = jax.random.normal(k_x, (B, n_dim), dtype=jnp.float32)
    w = jax.random.normal(k_w, (n_dim,), dtype=jnp.float32)

    out = jax.block_until_ready(adaptation_forward(x, w))
    ref = adaptation_reference(x, w)
    assert out.shape == (B, n_dim)
    assert jnp.allclose(out, ref, atol=1e-6, rtol=1e-6), "mismatch vs reference"

    # Module default init (ones) -> relu(W) == W -> identity on x.
    w_ones = jnp.ones((n_dim,), dtype=jnp.float32)
    out_ones = jax.block_until_ready(adaptation_forward(x, w_ones))
    assert jnp.allclose(out_ones, x, atol=1e-6, rtol=1e-6)

    # Exercise the weight-resident, batch-tiled path (including a partial
    # last tile: 2500 rows with tb=1024).
    B2 = 2500
    x2 = jax.random.normal(k_x2, (B2, n_dim), dtype=jnp.float32)
    out2 = jax.block_until_ready(adaptation_forward(x2, w, tb=1024))
    assert jnp.allclose(out2, adaptation_reference(x2, w), atol=1e-6, rtol=1e-6)

    print("KERNEL_OK")
</pallas_src>

<mosaic_0001>
module attributes {stable_mosaic.version = 11 : i64} {
  func.func @_adaptation_kernel(%arg0: memref<8x128xf32, #tpu.memory_space<vmem>>, %arg1: memref<1x128xf32, #tpu.memory_space<vmem>>, %arg2: memref<8x128xf32, #tpu.memory_space<vmem>>) attributes {dimension_semantics = [], scalar_prefetch = 0 : i64, scratch_operands = 0 : i64, tpu.core_type = #tpu.core_type<tc>} {
    %c0 = arith.constant 0 : index
    %c0_0 = arith.constant 0 : index
    %0 = vector.load %arg1[%c0, %c0_0] : memref<1x128xf32, #tpu.memory_space<vmem>>, vector<1x128xf32>
    %cst = arith.constant 0.000000e+00 : f32
    %1 = vector.broadcast %cst : f32 to vector<1x128xf32>
    %2 = arith.maximumf %0, %1 : vector<1x128xf32>
    %c0_1 = arith.constant 0 : index
    %c0_2 = arith.constant 0 : index
    %3 = vector.load %arg0[%c0_1, %c0_2] : memref<8x128xf32, #tpu.memory_space<vmem>>, vector<8x128xf32>
    %4 = vector.broadcast %2 : vector<1x128xf32> to vector<8x128xf32>
    %5 = arith.mulf %3, %4 : vector<8x128xf32>
    %c0_3 = arith.constant 0 : index
    %c0_4 = arith.constant 0 : index
    %6 = vector.load %arg2[%c0_3, %c0_4] : memref<8x128xf32, #tpu.memory_space<vmem>>, vector<8x128xf32>
    tpu.vector_store %arg2[%c0_3, %c0_4], %5 {strides = array<i32>} : memref<8x128xf32, #tpu.memory_space<vmem>>, vector<8x128xf32>,
    return
  }
}

</mosaic_0001>

<bundles_post_ra>
// kernel: tpu_custom_call.1
= control target key start
LH: loop header
LB: loop body
LE: loop exit
PB: predicated region body
PF: predicated region fallthrough
CT: control target
= control target key end

     0   :  { %7 = vsyncpa [#allocation3], 0  ;;  %s144_s0 = inlined_call_operand.hbm [shape: f32[8,128], index: 0, kind: input, shape index: {}]   ;;  %s145_s1 = inlined_call_operand.vmem [shape: f32[1,128], index: 1, kind: input, shape index: {}]   ;;  %s146_s2 = inlined_call_operand.hbm [shape: f32[8,128], index: 2, kind: output, shape index: {}]  }
   0x1   :  { %8 = vsyncpa [#allocation4], 0  ;;  %s100_s9 = smov [#allocation2]   ;;  %s52_s13 = scalar_lea.hbm %s144_s0, 128 }
   0x2   :  { %s15_s10 = sshll.u32 %s100_s9, 4  ;;  %p53_p0 = scmp.ne.s32.totalorder %s144_s0, %s52_s13  ;;  %s16_s10 = int_to_ptr.vmem [resolvable:$true] %s15_s10 }
   0x3   :  { %p56_p1 = scmp.lt.u32.totalorder %s52_s13, %s144_s0 }
   0x5   :  { %p58_p2 = pnand %p56_p1, %p53_p0 }
   0x7   :  { %61 = shalt.err (!%p58_p2)
}
   0x8   :  { %s62_s18 = scalar_lea.vmem %s16_s10, 128  ;;  %p67_p4 = scmp.lt.s32.totalorder %s16_s10, %s16_s10 }
   0x9   :  { %p63_p3 = scmp.ne.s32.totalorder %s16_s10, %s62_s18  ;;  %p68_p5 = scmp.lt.s32.totalorder %s62_s18, %s62_s18 }
   0xb   :  { %p69_p6 = por %p68_p5, %p67_p4 }
   0xd   :  { %p70_p7 = pnand %p69_p6, %p63_p3 }
   0xf   :  { %73 = shalt.err (!%p70_p7)
}
  0x10   :  { %18 = dma.hbm_to_vmem [thread:$0]  %s144_s0, 128, %s16_s10, [#allocation3]  }
  0x11   :  { %96 = dma.done.wait [#allocation3], 128  }
  0x12   :  { %97 = vsyncadd [#allocation3], 4294967168  ;;  %v28_v0 = vlaneseq  ;;  %v24_v3 = vld [vmem:[%s145_s1] sm:$0x1]  ;;  %s101_s23 = smov [#allocation5]  }
  0x13   :  { %v25_v4 = vmax.f32 %v24_v3, 0.0  ;;  %v26_v5 = vld [vmem:[#allocation2] sm:$0xff]  ;;  %s41_s24 = sshll.u32 %s101_s23, 4  ;;  %s42_s24 = int_to_ptr.vmem [resolvable:$true] %s41_s24 }
  0x14   :  { %v29_v1 = vshrl.u32 %v28_v0, 7  ;;  %s74_s25 = scalar_lea.vmem %s42_s24, 128  ;;  %p79_p9 = scmp.lt.s32.totalorder %s42_s24, %s42_s24 }
  0x15   :  { %p75_p8 = scmp.ne.s32.totalorder %s42_s24, %s74_s25  ;;  %p80_p10 = scmp.lt.s32.totalorder %s74_s25, %s74_s25 }
  0x16   :  { %v30_v2 = vsub.s32 0, %v29_v1 }
  0x17   :  { %p81_p11 = por %p80_p10, %p79_p9 }
  0x18   :  { %v31_v6 = vrot.slane %v25_v4, %v30_v2 }
  0x19   :  { %p82_p12 = pnand %p81_p11, %p75_p8 }
  0x1a   :  { %v33_v7 = vmul.f32 %v31_v6, %v26_v5 }
  0x1c   :  { %34 = vst [vmem:[#allocation5] sm:$0xff] %v33_v7 }
  0x1d   :  { %85 = shalt.err (!%p82_p12)
}
  0x1e   :  { %s86_s27 = scalar_lea.hbm %s146_s2, 128 }
  0x1f   :  { %p87_p13 = scmp.ne.s32.totalorder %s146_s2, %s86_s27  ;;  %p90_p0 = scmp.lt.u32.totalorder %s86_s27, %s146_s2 }
  0x21   :  { %p92_p1 = pnand %p90_p0, %p87_p13 }
  0x23   :  { %95 = shalt.err (!%p92_p1)
}
  0x24   :  { %44 = dma.vmem_to_hbm [thread:$0]  %s42_s24, 128, %s146_s2, [#allocation4]  }
  0x25   :  { %98 = dma.done.wait [#allocation4], 128  }
  0x26   :  { %99 = vsyncadd [#allocation4], 4294967168 }
  0x27   :  { %48 = vsyncpa [#allocation3], 1 }
  0x28   :  { %49 = vsyncpa [#allocation4], 1 }

</bundles_post_ra>
